<compile_context>
chip_gen: v6e
topology: v6e:2x2x1
jax: 0.10.0
libtpu: 0.0.40
codegen_flags: <defaults>
</compile_context>

<pallas_src>
import jax
import jax.numpy as jnp
from jax.experimental import pallas as pl
from jax.experimental.pallas import tpu as pltpu

_LANES = 128
_WIDTHS = (4096, 2048, 1024, 512, 256, 128)

# Inputs up to this many bytes go through one no-grid pallas_call.  Kept small
# so 0.5-2 MiB inputs still get a >=2-step parallel grid (pipelining + v7x
# megacore sharding).
_SINGLE_BLOCK_MAX_BYTES = 512 * 1024

# Ragged (size % 128 != 0) inputs below this take the tiny tail-pad path;
# above it, the multiple-of-128 prefix goes through the kernel and the <128
# element tail is handled in plain jnp (no full-array concatenate pad).
_RAGGED_PAD_MAX_BYTES = 1024 * 1024


def _target_block_bytes():
    """Per-generation tile budget for the tiled (gridded) path.

    Double-buffered in+out => pipelined VMEM footprint ~= 4x this value:
      v5e: 2 MiB -> ~8 MiB,  well under the 16 MiB scoped-VMEM default.
      v6e: 4 MiB -> ~16 MiB, far under the 32 MiB default (128 MiB physical).
      v7x: 6 MiB -> ~24 MiB, under the 32 MiB default (64 MiB physical);
           bigger blocks re-amortize the ~0.35 us per-grid-step overhead
           against v7x's ~3.2 TB/s HBM.
    """
    try:
        kind = jax.devices()[0].device_kind.lower()
    except Exception:
        kind = ""
    if "v7" in kind:
        return 6 << 20
    if "v6" in kind:
        return 4 << 20
    return 2 << 20  # v5e / unknown: conservative


def _sublane_rows(dtype):
    """Native sublane tile: 8 rows for f32, 16 for bf16/f16, 32 for int8/fp8."""
    return 8 * max(1, 4 // jnp.dtype(dtype).itemsize)


def _ftanh_kernel(x_ref, o_ref):
    x = x_ref[...]
    t = jnp.tanh(x)                                   # EUP (free slot)
    res = jnp.where(x < 0, -1.0 - t, 1.0 - t)         # VPU: select + sub
    o_ref[...] = res.astype(o_ref.dtype)


def _ftanh_jnp(x):
    # Same reformulation; used only for tiny (<128 element) ragged tails.
    return (jnp.where(x < 0, -1.0, 1.0) - jnp.tanh(x)).astype(x.dtype)


def _factor_2d(n, sub):
    """Pick lane-dense (rows, width): rows*width == n, width % 128 == 0.

    Prefers the widest width that still gives >= `sub` rows (full sublane
    tiles); falls back to width=128 (max rows). Requires n % 128 == 0.
    """
    for w in _WIDTHS:
        if n % w == 0 and n // w >= sub:
            return n // w, w
    return n // _LANES, _LANES


def _prefer_divisor(rows, row_tile, sub):
    """Nudge row_tile down to a nearby divisor of rows (no masked last block)."""
    if rows % row_tile == 0:
        return row_tile
    t = row_tile - sub
    lo = max(sub, row_tile // 2)
    while t >= lo:
        if rows % t == 0:
            return t
        t -= sub
    return row_tile


def _single_block_call(x2d):
    # Whole array as one VMEM block; no grid, no pipeline overhead.
    return pl.pallas_call(
        _ftanh_kernel,
        out_shape=jax.ShapeDtypeStruct(x2d.shape, x2d.dtype),
    )(x2d)


def _tiled_call(x2d):
    rows, w = x2d.shape
    itemsize = jnp.dtype(x2d.dtype).itemsize
    sub = _sublane_rows(x2d.dtype)
    block_bytes = _target_block_bytes()

    # Rows per block targeting ~block_bytes, rounded to the native sublane tile.
    row_tile = max(sub, (block_bytes // (w * itemsize)) // sub * sub)
    # Force >= 2 grid steps so the pipeline overlaps DMA with compute and the
    # "parallel" axis shards across both TensorCores on v7x.
    if rows >= 2 * sub:
        row_tile = min(row_tile, max(sub, (rows // (2 * sub)) * sub))
    row_tile = min(row_tile, rows)
    row_tile = _prefer_divisor(rows, row_tile, sub)

    grid = (pl.cdiv(rows, row_tile),)
    # TODO(synk): sweep pipeline_mode=pl.Buffered(3) on hardware; kept at the
    # default double-buffering so every generation stays inside its scoped
    # VMEM default without an explicit vmem_limit_bytes bump.
    return pl.pallas_call(
        _ftanh_kernel,
        out_shape=jax.ShapeDtypeStruct((rows, w), x2d.dtype),
        grid_spec=pltpu.PrefetchScalarGridSpec(
            num_scalar_prefetch=0,
            grid=grid,
            in_specs=[pl.BlockSpec((row_tile, w), lambda i: (i, 0))],
            out_specs=pl.BlockSpec((row_tile, w), lambda i: (i, 0)),
        ),
        compiler_params=pltpu.CompilerParams(
            dimension_semantics=("parallel",)),   # shards across v7x's 2 TCs
    )(x2d)


def _apply_aligned(flat, n):
    """FTanh on a flat array whose length n is a multiple of 128."""
    dtype = flat.dtype
    sub = _sublane_rows(dtype)
    rows, w = _factor_2d(n, sub)
    x2d = flat.reshape(rows, w)      # free (contiguous) reshape
    if n * jnp.dtype(dtype).itemsize <= _SINGLE_BLOCK_MAX_BYTES:
        return _single_block_call(x2d).reshape(-1)
    return _tiled_call(x2d).reshape(-1)


def ftanh(x):
    """Apply FTanh elementwise to an arbitrary-shaped float array."""
    orig_shape = x.shape
    n = x.size
    if n == 0:
        return x
    flat = x.reshape(-1)
    itemsize = jnp.dtype(x.dtype).itemsize

    if n % _LANES == 0:
        return _apply_aligned(flat, n).reshape(orig_shape)

    if n * itemsize <= _RAGGED_PAD_MAX_BYTES:
        # Small ragged: pad with <=127 zeros to a lane-dense (rows, 128) slab
        # (full (8,128) vreg occupancy — never a (1, n) block).
        pad = (-n) % _LANES
        out = _apply_aligned(jnp.pad(flat, (0, pad)), n + pad)
        return out[:n].reshape(orig_shape)

    # Large ragged: kernel on the multiple-of-128 prefix, plain jnp on the
    # <128-element tail; avoids the full-array concatenate pad + full slice.
    # TODO(synk): a fully copy-free ragged path would need an
    # overlapping-last-block kernel (pl.Element offsets).
    n_main = (n // _LANES) * _LANES
    out_main = _apply_aligned(flat[:n_main], n_main)
    out_tail = _ftanh_jnp(flat[n_main:])
    return jnp.concatenate([out_main, out_tail]).reshape(orig_shape)


def ftanh_ref(x):
    # Exact PyTorch formula (exp-based), as the independent reference.
    s = 2.0 / (1.0 + jnp.exp(-2.0 * x))
    return jnp.where(x < 0, -s, 2.0 - s)


if __name__ == "__main__":
    key = jax.random.PRNGKey(0)
    # NCHW input, same convention the PyTorch module would see.
    x = jax.random.normal(key, (2, 4, 16, 16), dtype=jnp.float32)
    out = jax.block_until_ready(ftanh(x))
    assert out.shape == x.shape
    assert out.dtype == x.dtype
    # Kernel uses the tanh reformulation; vs the exp-based reference the
    # difference is at the ~1e-7 level, so tolerance is mildly loosened.
    assert jnp.allclose(out, ftanh_ref(x), atol=1e-5, rtol=1e-5)

    # Tiled, multi-block (megacore-parallel) path.
    x_big = jax.random.normal(jax.random.PRNGKey(1), (4, 64, 64, 64),
                              dtype=jnp.float32)
    out_big = jax.block_until_ready(ftanh(x_big))
    assert jnp.allclose(out_big, ftanh_ref(x_big), atol=1e-5, rtol=1e-5)

    # Small ragged (non-multiple-of-128): lane-dense tail-pad path.
    x_odd = jax.random.normal(jax.random.PRNGKey(2), (3, 5, 7),
                              dtype=jnp.float32)
    out_odd = jax.block_until_ready(ftanh(x_odd))
    assert jnp.allclose(out_odd, ftanh_ref(x_odd), atol=1e-5, rtol=1e-5)

    # Large ragged: multiple-of-128 prefix through the kernel + jnp tail.
    x_rag = jax.random.normal(jax.random.PRNGKey(3), (262163,),
                              dtype=jnp.float32)
    out_rag = jax.block_until_ready(ftanh(x_rag))
    assert jnp.allclose(out_rag, ftanh_ref(x_rag), atol=1e-5, rtol=1e-5)

    print("KERNEL_OK")
</pallas_src>

<mosaic_0001>
module attributes {stable_mosaic.version = 11 : i64} {
  func.func @_ftanh_kernel(%arg0: memref<8x256xf32, #tpu.memory_space<vmem>>, %arg1: memref<8x256xf32, #tpu.memory_space<vmem>>) attributes {dimension_semantics = [], scalar_prefetch = 0 : i64, scratch_operands = 0 : i64, tpu.core_type = #tpu.core_type<tc>} {
    %c0 = arith.constant 0 : index
    %c0_0 = arith.constant 0 : index
    %0 = vector.load %arg0[%c0, %c0_0] : memref<8x256xf32, #tpu.memory_space<vmem>>, vector<8x256xf32>
    %1 = math.tanh %0 : vector<8x256xf32>
    %cst = arith.constant 0.000000e+00 : f32
    %2 = vector.broadcast %cst : f32 to vector<8x256xf32>
    %3 = arith.cmpf olt, %0, %2 : vector<8x256xf32>
    %cst_1 = arith.constant -1.000000e+00 : f32
    %4 = vector.broadcast %cst_1 : f32 to vector<8x256xf32>
    %5 = arith.subf %4, %1 : vector<8x256xf32>
    %cst_2 = arith.constant 1.000000e+00 : f32
    %6 = vector.broadcast %cst_2 : f32 to vector<8x256xf32>
    %7 = arith.subf %6, %1 : vector<8x256xf32>
    %8 = arith.select %3, %5, %7 : vector<8x256xi1>, vector<8x256xf32>
    %c0_3 = arith.constant 0 : index
    %c0_4 = arith.constant 0 : index
    %9 = vector.load %arg1[%c0_3, %c0_4] : memref<8x256xf32, #tpu.memory_space<vmem>>, vector<8x256xf32>
    tpu.vector_store %arg1[%c0_3, %c0_4], %8 {strides = array<i32>} : memref<8x256xf32, #tpu.memory_space<vmem>>, vector<8x256xf32>,
    return
  }
}

</mosaic_0001>

<bundles_post_ra>
// kernel: tpu_custom_call.1
= control target key start
LH: loop header
LB: loop body
LE: loop exit
PB: predicated region body
PF: predicated region fallthrough
CT: control target
= control target key end

     0   :  { %6 = vsyncpa [#allocation3], 0  ;;  %s118_s0 = inlined_call_operand.hbm [shape: f32[8,256], index: 0, kind: input, shape index: {}]   ;;  %s119_s1 = inlined_call_operand.hbm [shape: f32[8,256], index: 1, kind: output, shape index: {}]  }
   0x1   :  { %7 = vsyncpa [#allocation4], 0  ;;  %s100_s6 = smov [#allocation2]  }
   0x2   :  { %s14_s7 = sshll.u32 %s100_s6, 4  ;;  %s15_s7 = int_to_ptr.vmem [resolvable:$true] %s14_s7 }
   0x3   :  { %s64_s8 = scalar_lea.vmem %s15_s7, 256  ;;  %p69_p1 = scmp.lt.s32.totalorder %s15_s7, %s15_s7 }
   0x4   :  { %p65_p0 = scmp.ne.s32.totalorder %s15_s7, %s64_s8  ;;  %p70_p2 = scmp.lt.s32.totalorder %s64_s8, %s64_s8 }
   0x6   :  { %p71_p3 = por %p70_p2, %p69_p1 }
   0x8   :  { %p72_p4 = pnand %p71_p3, %p65_p0 }
   0xa   :  { %75 = shalt.err (!%p72_p4)
}
   0xb   :  { %17 = dma.hbm_to_vmem [thread:$0]  %s118_s0, 256, %s15_s7, [#allocation3]  }
   0xc   :  { %96 = dma.done.wait [#allocation3], 256  }
   0xd   :  { %97 = vsyncadd [#allocation3], 4294967040  ;;  %v21_v0 = vld [vmem:[#allocation2] sm:$0xff]  ;;  %v22_v1 = vld [vmem:[#allocation2 + $0x8] sm:$0xff]  ;;  %s101_s11 = smov [#allocation5]  }
   0xe   :  { %52 = vtanh.f32 %v21_v0  ;;  %vm25_vm0 = vcmp.lt.f32.partialorder %v21_v0, 0.0  ;;  %s41_s12 = sshll.u32 %s101_s11, 4  ;;  %vm26_vm1 = vcmp.lt.f32.partialorder %v22_v1, 0.0  ;;  %s42_s12 = int_to_ptr.vmem [resolvable:$true] %s41_s12 }
   0xf   :  { %54 = vtanh.f32 %v22_v1  ;;  %s76_s0 = scalar_lea.vmem %s42_s12, 256  ;;  %p81_p6 = scmp.lt.s32.totalorder %s42_s12, %s42_s12 }
  0x10   :  { %p77_p5 = scmp.ne.s32.totalorder %s42_s12, %s76_s0  ;;  %p82_p7 = scmp.lt.s32.totalorder %s76_s0, %s76_s0 }
  0x12   :  { %p83_p8 = por %p82_p7, %p81_p6 }
  0x14   :  { %p84_p9 = pnand %p83_p8, %p77_p5 }
  0x1b   :  { %v53_v2 = vpop.eup %52 }
  0x1c   :  { %v55_v3 = vpop.eup %54  ;;  %v27_v4 = vsub.f32 -1.0, %v53_v2  ;;  %v29_v5 = vsub.f32 1.0, %v53_v2 }
  0x1d   :  { %v28_v6 = vsub.f32 -1.0, %v55_v3  ;;  %v30_v7 = vsub.f32 1.0, %v55_v3 }
  0x1e   :  { %v31_v8 = vsel %vm25_vm0, %v27_v4, %v29_v5 }
  0x1f   :  { %33 = vst [vmem:[#allocation5] sm:$0xff] %v31_v8  ;;  %v32_v9 = vsel %vm26_vm1, %v28_v6, %v30_v7 }
  0x20   :  { %34 = vst [vmem:[#allocation5 + $0x8] sm:$0xff] %v32_v9 }
  0x21   :  { %87 = shalt.err (!%p84_p9)
}
  0x22   :  { %44 = dma.vmem_to_hbm [thread:$0]  %s42_s12, 256, %s119_s1, [#allocation4]  }
  0x23   :  { %98 = dma.done.wait [#allocation4], 256  }
  0x24   :  { %99 = vsyncadd [#allocation4], 4294967040 }
  0x25   :  { %48 = vsyncpa [#allocation3], 1 }
  0x26   :  { %49 = vsyncpa [#allocation4], 1 }

</bundles_post_ra>
